<compile_context>
chip_gen: v5e
topology: v5e:2x2
jax: 0.10.0
libtpu: 0.0.40
codegen_flags: <defaults>
</compile_context>

<pallas_src>
import functools

import jax
import jax.numpy as jnp
from jax.experimental import pallas as pl
from jax.experimental.pallas import tpu as pltpu


def _pick_tile(dim, candidates):
    """Largest candidate that divides `dim`, else the full dim (always legal)."""
    for c in candidates:
        if c <= dim and dim % c == 0:
            return c
    return dim


def _bn_stats_kernel(x_ref, sum_ref, sq_ref):
    """Accumulate per-row sum and sum-of-squares over the K (reduction) grid axis."""
    k = pl.program_id(1)

    @pl.when(k == 0)
    def _():
        sum_ref[...] = jnp.zeros_like(sum_ref)
        sq_ref[...] = jnp.zeros_like(sq_ref)

    x = x_ref[...].astype(jnp.float32)
    sum_ref[...] += jnp.sum(x, axis=1, keepdims=True)
    sq_ref[...] += jnp.sum(x * x, axis=1, keepdims=True)


def _bn_apply_kernel(x_ref, scale_ref, shift_ref, o_ref):
    """out = x * scale + shift  (scale/shift are per-row (tm,1), broadcast over lanes)."""
    x = x_ref[...].astype(jnp.float32)
    o_ref[...] = (x * scale_ref[...] + shift_ref[...]).astype(o_ref.dtype)


@functools.partial(jax.jit, static_argnames=("eps",))
def _bn_train_core(x, gamma, beta, eps):
    """Batch-norm forward with batch statistics (training=True path of F.batch_norm).

    Returns (out, batch_mean, batch_var_biased)."""
    N, C, H, W = x.shape
    M, K = N * C, H * W
    x2 = x.reshape(M, K)  # contiguous view, no transpose / copy

    tk = _pick_tile(K, (2048, 1024, 512, 256, 128))
    tm = _pick_tile(M, (1024, 512, 256, 128, 64, 32, 16, 8))
    # Cap the per-tile footprint (~1 MiB f32) so double-buffered in+out stays far
    # below the v7x 64 MiB VMEM budget while tiles remain large enough to hide
    # per-grid-step overhead.
    max_tile_elems = 256 * 1024
    while tm > 8 and tm * tk > max_tile_elems and M % (tm // 2) == 0:
        tm //= 2

    grid = (M // tm, K // tk)
    cparams_stats = pltpu.CompilerParams(
        dimension_semantics=("parallel", "arbitrary"),
        vmem_limit_bytes=48 * 1024 * 1024,
    )
    cparams_apply = pltpu.CompilerParams(
        dimension_semantics=("parallel", "parallel"),
        vmem_limit_bytes=48 * 1024 * 1024,
    )

    # ---- pass 1: per-row (n,c) partial statistics ----
    row_sum, row_sq = pl.pallas_call(
        _bn_stats_kernel,
        out_shape=(
            jax.ShapeDtypeStruct((M, 1), jnp.float32),
            jax.ShapeDtypeStruct((M, 1), jnp.float32),
        ),
        grid_spec=pltpu.PrefetchScalarGridSpec(
            num_scalar_prefetch=0,
            grid=grid,
            in_specs=[pl.BlockSpec((tm, tk), lambda i, k: (i, k))],
            out_specs=(
                pl.BlockSpec((tm, 1), lambda i, k: (i, 0)),
                pl.BlockSpec((tm, 1), lambda i, k: (i, 0)),
            ),
        ),
        compiler_params=cparams_stats,
    )(x2)

    # ---- O(C) finalize in plain JAX (negligible) ----
    count = N * H * W
    ch_sum = row_sum.reshape(N, C).sum(axis=0)
    ch_sq = row_sq.reshape(N, C).sum(axis=0)
    mean = ch_sum / count
    var = jnp.maximum(ch_sq / count - mean * mean, 0.0)  # biased var (ddof=0)

    inv_std = 1.0 / jnp.sqrt(var + eps)
    scale = gamma.astype(jnp.float32) * inv_std           # (C,)
    shift = beta.astype(jnp.float32) - mean * scale       # (C,)

    # Per-row (n,c) broadcast of the per-channel affine (row index = n*C + c).
    scale_rows = jnp.tile(scale, N).reshape(M, 1)
    shift_rows = jnp.tile(shift, N).reshape(M, 1)

    # ---- pass 2: normalize + affine, fused multiply-add ----
    out2 = pl.pallas_call(
        _bn_apply_kernel,
        out_shape=jax.ShapeDtypeStruct((M, K), x.dtype),
        grid_spec=pltpu.PrefetchScalarGridSpec(
            num_scalar_prefetch=0,
            grid=grid,
            in_specs=[
                pl.BlockSpec((tm, tk), lambda i, k: (i, k)),
                pl.BlockSpec((tm, 1), lambda i, k: (i, 0)),
                pl.BlockSpec((tm, 1), lambda i, k: (i, 0)),
            ],
            out_specs=pl.BlockSpec((tm, tk), lambda i, k: (i, k)),
        ),
        compiler_params=cparams_apply,
    )(x2, scale_rows, shift_rows)

    return out2.reshape(N, C, H, W), mean, var


def meta_batch_norm_forward(x, weight, bias, running_mean=None, running_var=None,
                            num_step=0, momentum=0.1, eps=1e-5):
    """Mirror of MetaBatchNormLayer.forward.

    weight/bias may be per-step, shape (num_steps, C), or plain (C,).
    running_mean/var (optional) likewise; they are NOT used for normalization
    (the module always runs F.batch_norm with training=True) but are updated with
    the momentum rule and returned.
    """
    if weight.ndim == 2:                     # use_per_step_bn_statistics path
        gamma, beta = weight[num_step], bias[num_step]
    else:
        gamma, beta = weight, bias

    out, batch_mean, batch_var = _bn_train_core(x, gamma, beta, float(eps))

    new_running_mean = new_running_var = None
    if running_mean is not None and running_var is not None:
        rm = running_mean[num_step] if running_mean.ndim == 2 else running_mean
        rv = running_var[num_step] if running_var.ndim == 2 else running_var
        n = x.shape[0] * x.shape[2] * x.shape[3]
        unbiased_var = batch_var * (n / max(n - 1, 1))
        new_rm = (1.0 - momentum) * rm + momentum * batch_mean
        new_rv = (1.0 - momentum) * rv + momentum * unbiased_var
        if running_mean.ndim == 2:
            new_running_mean = running_mean.at[num_step].set(new_rm)
            new_running_var = running_var.at[num_step].set(new_rv)
        else:
            new_running_mean, new_running_var = new_rm, new_rv

    return out, new_running_mean, new_running_var


if __name__ == "__main__":
    # Small shapes consistent with the module: NCHW input + per-step BN params.
    num_training_steps = 5
    batch, channels, height, width = 2, 4, 16, 16
    num_step = 2
    momentum, eps = 0.1, 1e-5

    key = jax.random.PRNGKey(0)
    kx, kg, kb = jax.random.split(key, 3)
    x = jax.random.normal(kx, (batch, channels, height, width), dtype=jnp.float32)
    weight = 1.0 + 0.1 * jax.random.normal(
        kg, (num_training_steps, channels), dtype=jnp.float32)
    bias = 0.1 * jax.random.normal(
        kb, (num_training_steps, channels), dtype=jnp.float32)
    running_mean = jnp.zeros((num_training_steps, channels), jnp.float32)
    running_var = jnp.ones((num_training_steps, channels), jnp.float32)

    out, new_rm, new_rv = meta_batch_norm_forward(
        x, weight, bias, running_mean, running_var,
        num_step=num_step, momentum=momentum, eps=eps)
    out = jax.block_until_ready(out)

    # Pure-JAX reference of F.batch_norm(..., training=True).
    g, b = weight[num_step], bias[num_step]
    m = x.mean(axis=(0, 2, 3))
    v = x.var(axis=(0, 2, 3))                       # biased var, as used for normalization
    ref = ((x - m[None, :, None, None]) / jnp.sqrt(v[None, :, None, None] + eps)
           * g[None, :, None, None] + b[None, :, None, None])
    assert out.shape == x.shape
    assert jnp.allclose(out, ref, atol=1e-5, rtol=1e-5), "output mismatch vs reference"

    # Running-stat side-effect check (momentum update with unbiased batch var).
    n = batch * height * width
    ref_rm = (1 - momentum) * running_mean[num_step] + momentum * m
    ref_rv = (1 - momentum) * running_var[num_step] + momentum * (v * n / (n - 1))
    assert jnp.allclose(new_rm[num_step], ref_rm, atol=1e-5, rtol=1e-5)
    assert jnp.allclose(new_rv[num_step], ref_rv, atol=1e-5, rtol=1e-5)

    print("KERNEL_OK")
</pallas_src>

<mosaic_0001>
module attributes {stable_mosaic.version = 11 : i64} {
  func.func @_bn_stats_kernel(%arg0: i32, %arg1: i32, %arg2: memref<8x256xf32, #tpu.memory_space<vmem>>, %arg3: memref<8x1xf32, #tpu.memory_space<vmem>>, %arg4: memref<8x1xf32, #tpu.memory_space<vmem>>) attributes {dimension_semantics = [#tpu.dimension_semantics<parallel>, #tpu.dimension_semantics<arbitrary>], iteration_bounds = array<i64: 1, 1>, scalar_prefetch = 0 : i64, scratch_operands = 0 : i64, tpu.core_type = #tpu.core_type<tc>, window_params = [{transform_indices = @transform_0, window_bounds = array<i64: 8, 256>}, {transform_indices = @transform_1, window_bounds = array<i64: 8, 1>}, {transform_indices = @transform_2, window_bounds = array<i64: 8, 1>}]} {
    %c0_i32 = arith.constant 0 : i32
    %0 = arith.cmpi eq, %arg1, %c0_i32 : i32
    %1 = arith.extui %0 : i1 to i32
    %c0_i32_0 = arith.constant 0 : i32
    %2 = arith.cmpi ne, %1, %c0_i32_0 : i32
    scf.if %2 {
      %cst_11 = arith.constant 0.000000e+00 : f32
      %15 = vector.broadcast %cst_11 : f32 to vector<8x1xf32>
      %c0_12 = arith.constant 0 : index
      %c0_13 = arith.constant 0 : index
      %16 = vector.load %arg3[%c0_12, %c0_13] : memref<8x1xf32, #tpu.memory_space<vmem>>, vector<8x1xf32>
      tpu.vector_store %arg3[%c0_12, %c0_13], %15 {strides = array<i32>} : memref<8x1xf32, #tpu.memory_space<vmem>>, vector<8x1xf32>,
      %cst_14 = arith.constant 0.000000e+00 : f32
      %17 = vector.broadcast %cst_14 : f32 to vector<8x1xf32>
      %c0_15 = arith.constant 0 : index
      %c0_16 = arith.constant 0 : index
      %18 = vector.load %arg4[%c0_15, %c0_16] : memref<8x1xf32, #tpu.memory_space<vmem>>, vector<8x1xf32>
      tpu.vector_store %arg4[%c0_15, %c0_16], %17 {strides = array<i32>} : memref<8x1xf32, #tpu.memory_space<vmem>>, vector<8x1xf32>,
    } else {
    }
    %c0 = arith.constant 0 : index
    %c0_1 = arith.constant 0 : index
    %3 = vector.load %arg2[%c0, %c0_1] : memref<8x256xf32, #tpu.memory_space<vmem>>, vector<8x256xf32>
    %c0_2 = arith.constant 0 : index
    %c0_3 = arith.constant 0 : index
    %4 = vector.load %arg3[%c0_2, %c0_3] : memref<8x1xf32, #tpu.memory_space<vmem>>, vector<8x1xf32>
    %cst = arith.constant dense<0.000000e+00> : vector<8xf32>
    %5 = vector.multi_reduction <add>, %3, %cst [1] : vector<8x256xf32> to vector<8xf32>
    %6 = vector.shape_cast %5 : vector<8xf32> to vector<8x1xf32>
    %7 = arith.addf %4, %6 : vector<8x1xf32>
    %c0_4 = arith.constant 0 : index
    %c0_5 = arith.constant 0 : index
    %8 = vector.load %arg3[%c0_4, %c0_5] : memref<8x1xf32, #tpu.memory_space<vmem>>, vector<8x1xf32>
    tpu.vector_store %arg3[%c0_4, %c0_5], %7 {strides = array<i32>} : memref<8x1xf32, #tpu.memory_space<vmem>>, vector<8x1xf32>,
    %c0_6 = arith.constant 0 : index
    %c0_7 = arith.constant 0 : index
    %9 = vector.load %arg4[%c0_6, %c0_7] : memref<8x1xf32, #tpu.memory_space<vmem>>, vector<8x1xf32>
    %10 = arith.mulf %3, %3 : vector<8x256xf32>
    %cst_8 = arith.constant dense<0.000000e+00> : vector<8xf32>
    %11 = vector.multi_reduction <add>, %10, %cst_8 [1] : vector<8x256xf32> to vector<8xf32>
    %12 = vector.shape_cast %11 : vector<8xf32> to vector<8x1xf32>
    %13 = arith.addf %9, %12 : vector<8x1xf32>
    %c0_9 = arith.constant 0 : index
    %c0_10 = arith.constant 0 : index
    %14 = vector.load %arg4[%c0_9, %c0_10] : memref<8x1xf32, #tpu.memory_space<vmem>>, vector<8x1xf32>
    tpu.vector_store %arg4[%c0_9, %c0_10], %13 {strides = array<i32>} : memref<8x1xf32, #tpu.memory_space<vmem>>, vector<8x1xf32>,
    return
  }
  func.func @transform_0(%arg0: i32, %arg1: i32) -> (i32, i32) {
    %c0_i32 = arith.constant 0 : i32
    return %arg0, %arg1 : i32, i32
  }
  func.func @transform_1(%arg0: i32, %arg1: i32) -> (i32, i32) {
    %c0_i32 = arith.constant 0 : i32
    %c0_i32_0 = arith.constant 0 : i32
    return %arg0, %c0_i32 : i32, i32
  }
  func.func @transform_2(%arg0: i32, %arg1: i32) -> (i32, i32) {
    %c0_i32 = arith.constant 0 : i32
    %c0_i32_0 = arith.constant 0 : i32
    return %arg0, %c0_i32 : i32, i32
  }
}

module attributes {stable_mosaic.version = 11 : i64} {
  func.func @_bn_apply_kernel(%arg0: i32, %arg1: i32, %arg2: memref<8x256xf32, #tpu.memory_space<vmem>>, %arg3: memref<8x1xf32, #tpu.memory_space<vmem>>, %arg4: memref<8x1xf32, #tpu.memory_space<vmem>>, %arg5: memref<8x256xf32, #tpu.memory_space<vmem>>) attributes {dimension_semantics = [#tpu.dimension_semantics<parallel>, #tpu.dimension_semantics<parallel>], iteration_bounds = array<i64: 1, 1>, scalar_prefetch = 0 : i64, scratch_operands = 0 : i64, tpu.core_type = #tpu.core_type<tc>, window_params = [{transform_indices = @transform_0, window_bounds = array<i64: 8, 256>}, {transform_indices = @transform_1, window_bounds = array<i64: 8, 1>}, {transform_indices = @transform_2, window_bounds = array<i64: 8, 1>}, {transform_indices = @transform_3, window_bounds = array<i64: 8, 256>}]} {
    %c0 = arith.constant 0 : index
    %c0_0 = arith.constant 0 : index
    %0 = vector.load %arg2[%c0, %c0_0] : memref<8x256xf32, #tpu.memory_space<vmem>>, vector<8x256xf32>
    %c0_1 = arith.constant 0 : index
    %c0_2 = arith.constant 0 : index
    %1 = vector.load %arg3[%c0_1, %c0_2] : memref<8x1xf32, #tpu.memory_space<vmem>>, vector<8x1xf32>
    %2 = vector.broadcast %1 : vector<8x1xf32> to vector<8x256xf32>
    %3 = arith.mulf %0, %2 : vector<8x256xf32>
    %c0_3 = arith.constant 0 : index
    %c0_4 = arith.constant 0 : index
    %4 = vector.load %arg4[%c0_3, %c0_4] : memref<8x1xf32, #tpu.memory_space<vmem>>, vector<8x1xf32>
    %5 = vector.broadcast %4 : vector<8x1xf32> to vector<8x256xf32>
    %6 = arith.addf %3, %5 : vector<8x256xf32>
    %c0_5 = arith.constant 0 : index
    %c0_6 = arith.constant 0 : index
    %7 = vector.load %arg5[%c0_5, %c0_6] : memref<8x256xf32, #tpu.memory_space<vmem>>, vector<8x256xf32>
    tpu.vector_store %arg5[%c0_5, %c0_6], %6 {strides = array<i32>} : memref<8x256xf32, #tpu.memory_space<vmem>>, vector<8x256xf32>,
    return
  }
  func.func @transform_0(%arg0: i32, %arg1: i32) -> (i32, i32) {
    %c0_i32 = arith.constant 0 : i32
    return %arg0, %arg1 : i32, i32
  }
  func.func @transform_1(%arg0: i32, %arg1: i32) -> (i32, i32) {
    %c0_i32 = arith.constant 0 : i32
    %c0_i32_0 = arith.constant 0 : i32
    return %arg0, %c0_i32 : i32, i32
  }
  func.func @transform_2(%arg0: i32, %arg1: i32) -> (i32, i32) {
    %c0_i32 = arith.constant 0 : i32
    %c0_i32_0 = arith.constant 0 : i32
    return %arg0, %c0_i32 : i32, i32
  }
  func.func @transform_3(%arg0: i32, %arg1: i32) -> (i32, i32) {
    %c0_i32 = arith.constant 0 : i32
    return %arg0, %arg1 : i32, i32
  }
}

</mosaic_0001>

<bundles_post_ra>
// kernel: tile.18
= control target key start
LH: loop header
LB: loop body
LE: loop exit
PB: predicated region body
PF: predicated region fallthrough
CT: control target
= control target key end

     0   :  { %s22_s0 = inlined_call_operand.vmem [shape: f32[4], index: 0, kind: input, shape index: {}]   ;;  %s23_s1 = inlined_call_operand.vmem [shape: f32[2,4], index: 1, kind: output, shape index: {}]  }
   0x1   :  { %v4_v0 = vld [vmem:[%s22_s0] ss:$0 sm:$0xff] }
   0x2   :  { %5 = vst [vmem:[%s23_s1] sm:$0x3] %v4_v0 }

// kernel: tile.0
= control target key start
LH: loop header
LB: loop body
LE: loop exit
PB: predicated region body
PF: predicated region fallthrough
CT: control target
= control target key end

     0   :  { %s34_s8 = smov 125   ;;  %s35_s9 = smov 126   ;;  %vm7_vm0 = vcmask 7168   ;;  %s61_s0 = inlined_call_operand.vmem [shape: f32[2,4], index: 0, kind: input, shape index: {}]   ;;  %s62_s1 = inlined_call_operand.vmem [shape: f32[8,1], index: 1, kind: output, shape index: {}]  }
   0x1   :  { %v4_v0 = vld [vmem:[%s61_s0] sm:$0x3]  ;;  %s33_s0 = smov 127  }
   0x2   :  { %5 = vst [vmem:[#allocation0] sm:$0x3] %v4_v0 }
   0x9   :  { %v9_v1 = vld [vmem:[#allocation0] sm:$0x3]  }
   0xa   :  { %v21_v2 = vld [vmem:[#allocation0] sm:$0x3]   ;;  %10 = vrot.lane.b32.xlu0 %v9_v1, %s33_s0 }
   0xb   :  { %22 = vrot.lane.b32.xlu1 %v21_v2, %s34_s8  ;;  %v15_v3 = vld [vmem:[#allocation0] sm:$0x3]  }
   0xc   :  { %v6_v4 = vld [vmem:[#allocation0] sm:$0x3]  }
   0xd   :  { %8 = vst.msk [vmem:[%s62_s1] ss:$4 sm:$0x3] %vm7_vm0, %v6_v4  }
  0x12   :  { %16 = vrot.lane.b32.xlu0 %v15_v3, %s35_s9 }
  0x7c   :  { %v11_v5 = vpop.permute.xlu0 %10  }
  0x7d   :  { %v23_v6 = vpop.permute.xlu1 %22   ;;  %27 = vst.msk [vmem:[%s62_s1 + $0x1] ss:$4 sm:$0x3] %vm7_vm0, %v11_v5  }
  0x7e   :  { %29 = vst.msk [vmem:[%s62_s1 + $0x3] ss:$4 sm:$0x3] %vm7_vm0, %v23_v6  }
  0x84   :  { %v17_v7 = vpop.permute.xlu0 %16  }
  0x85   :  { %28 = vst.msk [vmem:[%s62_s1 + $0x2] ss:$4 sm:$0x3] %vm7_vm0, %v17_v7  }

// kernel: _bn_train_core.2
= control target key start
LH: loop header
LB: loop body
LE: loop exit
PB: predicated region body
PF: predicated region fallthrough
CT: control target
= control target key end

     0   :  { %vm14_vm0 = vcmask 7168   ;;  %v43_v2 = vmov 0.0   ;;  %s87_s0 = inlined_call_operand.vmem [shape: f32[8,256], index: 0, kind: input, shape index: {}]   ;;  %s88_s1 = inlined_call_operand.vmem [shape: f32[8,1], index: 1, kind: output, shape index: {0}]   ;;  %s89_s2 = inlined_call_operand.vmem [shape: f32[8,1], index: 2, kind: output, shape index: {1}]  }
   0x1   :  { %v17_v0 = vld [vmem:[%s87_s0] sm:$0xff]  ;;  %v18_v1 = vld [vmem:[%s87_s0 + $0x8] sm:$0xff]  ;;  %15 = vst.msk [vmem:[%s88_s1] sm:$0xff] %vm14_vm0, %v43_v2 }
   0x2   :  { %v20_v3 = vadd.f32 %v18_v1, %v17_v0  ;;  %16 = vst.msk [vmem:[%s89_s2] sm:$0xff] %vm14_vm0, %v43_v2  ;;  %v27_v4 = vmul.f32 %v17_v0, %v17_v0  ;;  %v28_v5 = vmul.f32 %v18_v1, %v18_v1 }
   0x4   :  { %21 = vadd.xlane.f32.xlu0 %v20_v3  ;;  %v29_v6 = vadd.f32 %v28_v5, %v27_v4 }
   0x8   :  { %v19_v7 = vld [vmem:[%s88_s1] sm:$0xff] }
   0x9   :  { %v26_v10 = vld [vmem:[%s89_s2] sm:$0xff] }
   0xc   :  { %30 = vadd.xlane.f32.xlu0 %v29_v6 }
  0x77   :  { %v22_v8 = vpop.xlane.xlu0 %21 }
  0x78   :  { %v23_v9 = vadd.f32 %v22_v8, %v19_v7 }
  0x7a   :  { %25 = vst.msk [vmem:[%s88_s1] sm:$0xff] %vm14_vm0, %v23_v9 }
  0x7f   :  { %v31_v11 = vpop.xlane.xlu0 %30 }
  0x80   :  { %v32_v12 = vadd.f32 %v31_v11, %v26_v10 }
  0x82   :  { %33 = vst.msk [vmem:[%s89_s2] sm:$0xff] %vm14_vm0, %v32_v12 }

// kernel: _bn_train_core.3
= control target key start
LH: loop header
LB: loop body
LE: loop exit
PB: predicated region body
PF: predicated region fallthrough
CT: control target
= control target key end

     0   :  { %v40_v0 = vmov 0   ;;  %s79_s1 = inlined_call_operand.vmem [shape: f32[8,1], index: 1, kind: input, shape index: {}]   ;;  %s80_s2 = inlined_call_operand.vmem [shape: f32[8,1], index: 2, kind: input, shape index: {}]   ;;  %s81_s0 = inlined_call_operand.vmem [shape: f32[8,256], index: 0, kind: input, shape index: {}]   ;;  %s82_s3 = inlined_call_operand.vmem [shape: f32[8,256], index: 3, kind: output, shape index: {}]  }
   0x1   :  { %39 = vset.pattern.permute.xlu0 %v40_v0  ;;  %v16_v1 = vld [vmem:[%s79_s1] sm:$0xff]  ;;  %v15_v5 = vld [vmem:[%s81_s0 + $0x8] sm:$0xff] }
   0x2   :  { %19 = vperm.xlu0 %39, %v16_v1   ;;  %v24_v2 = vld [vmem:[%s80_s2] sm:$0xff] }
   0x3   :  { %v14_v4 = vld [vmem:[%s81_s0] sm:$0xff] }
   0xa   :  { %27 = vperm.xlu0 %39, %v24_v2  }
  0x74   :  { %v20_v3 = vpop.permute.xlu0 %19 }
  0x75   :  { %v22_v6 = vmul.f32 %v20_v3, %v14_v4  ;;  %v23_v7 = vmul.f32 %v20_v3, %v15_v5 }
  0x7c   :  { %v28_v8 = vpop.permute.xlu0 %27 }
  0x7d   :  { %v30_v9 = vadd.f32 %v28_v8, %v22_v6  ;;  %v31_v10 = vadd.f32 %v28_v8, %v23_v7 }
  0x7f   :  { %32 = vst [vmem:[%s82_s3] sm:$0xff] %v30_v9 }
  0x80   :  { %33 = vst [vmem:[%s82_s3 + $0x8] sm:$0xff] %v31_v10 }

</bundles_post_ra>
